<compile_context>
chip_gen: v7x
topology: tpu7x:2x2x1
jax: 0.10.0
libtpu: 0.0.40
codegen_flags: <defaults>
</compile_context>

<pallas_src>
import functools

import jax
import jax.numpy as jnp
import numpy as np
from jax.experimental import pallas as pl
from jax.experimental.pallas import tpu as pltpu

START_TAG = "<START>"
END_TAG = "<END>"

# Floor for log() of the exp-space contraction.  The START row of
# exp(transition) is all zeros (exp(-10000) underflows), so its row sum is 0;
# flooring at ~1e-37 gives log ~ -85, whose later contribution (~exp(-85)) is
# as negligible as the original -10000 sentinel, and avoids -inf/NaN hazards.
_LOG_FLOOR = 1e-37


def _crf_forward_kernel(feats_ref, mask_ref, exp_trans_ref, trans_end_ref,
                        out_ref, alpha_ref, *, start_idx, time_chunk, unroll,
                        precision):
    """One grid step == `time_chunk` timesteps of the CRF forward recurrence.

    Layouts (batch on lanes):
      feats_ref:     (time_chunk, M, B)  emission scores, native dtype
      mask_ref:      (time_chunk, B)     float32 {0,1}
      exp_trans_ref: (M, M)              exp(trans)[i, j], trans[i, j] = score(j -> i)
      trans_end_ref: (M, 1)              trans[END, :] as a column
      out_ref:       (1, B)              log partition (written on last chunk)
      alpha_ref:     (M, B)              alpha carry, alpha_ref[j, b] = alpha[b, j]
    """
    ti = pl.program_id(1)
    n_time = pl.num_programs(1)
    M, B = alpha_ref.shape

    # alpha init (once per batch tile): -10000 everywhere except START row.
    @pl.when(ti == 0)
    def _():
        row = jax.lax.broadcasted_iota(jnp.int32, (M, B), 0)
        alpha_ref[...] = jnp.where(row == start_idx, 0.0, -10000.0).astype(jnp.float32)

    # Time-invariant: exp(transition), resident for the whole chunk (1 vreg).
    exp_trans = exp_trans_ref[...]                                 # (M, M) f32

    def step(i, alpha):
        # alpha'[i,b] = feat[i,b] + logsumexp_j(alpha[j,b] + trans[i,j])
        #             = feat[i,b] + mx[b] + log(sum_j exp(trans[i,j]) * exp(alpha[j,b]-mx[b]))
        feat = feats_ref[i].astype(jnp.float32)                    # (M, B)
        m_t = mask_ref[pl.ds(i, 1), :]                             # (1, B)
        mx = jnp.max(alpha, axis=0, keepdims=True)                 # (1, B) sublane reduce
        p = jnp.exp(alpha - mx)                                    # (M, B): 1 EUP vreg/lane-tile
        # j-contraction on the MXU: (M, M) @ (M, B) -> (M, B)
        s = jnp.dot(exp_trans, p, preferred_element_type=jnp.float32,
                    precision=precision)
        lse = feat + mx + jnp.log(jnp.maximum(s, _LOG_FLOOR))      # (M, B)
        return jnp.where(m_t > 0.0, lse, alpha)                    # mask-gated carry

    alpha_ref[...] = jax.lax.fori_loop(0, time_chunk, step, alpha_ref[...],
                                       unroll=unroll)

    # Final chunk: add transition-to-END, logsumexp over tags -> (1, B).
    @pl.when(ti == n_time - 1)
    def _():
        a = alpha_ref[...] + trans_end_ref[...]                    # (M, B) + (M, 1)
        m2 = jnp.max(a, axis=0, keepdims=True)                     # (1, B)
        out_ref[...] = m2 + jnp.log(jnp.sum(jnp.exp(a - m2), axis=0, keepdims=True))


def crf_forward(feats, mask, transition, start_idx, end_idx,
                *, time_chunk=None, batch_tile=None, unroll=8, precision=None):
    """Pallas implementation of CRFLayer.forward.

    feats:      (T, B, M) float (any float dtype; upcast to f32 in-kernel)
    mask:       (T, B)    {0,1}
    transition: (M, M)    transition[i, j] = score of j -> i
    returns:    (B,) float32 log partition per batch element
    """
    T, B, M = feats.shape

    # --- time chunking (large chunks amortize per-grid-step overhead) ---
    if time_chunk is None:
        time_chunk = min(T, 128)
    if time_chunk < T:
        time_chunk = ((time_chunk + 7) // 8) * 8    # mask block sublane constraint
    n_chunks = pl.cdiv(T, time_chunk)
    T_pad = n_chunks * time_chunk

    # --- batch: always lane-dense (pad to a multiple of 128, mask=0 on pad) ---
    B_pad = ((B + 127) // 128) * 128
    if batch_tile is None:
        if B_pad % 256 == 0 and B_pad // 256 >= 2:
            batch_tile = 256    # 2 vregs/op: two independent chains interleave
        elif B_pad // 128 >= 2:
            batch_tile = 128    # >= 2 grid tiles: megacore split on v7x
        else:
            batch_tile = B_pad  # == 128
    assert B_pad % batch_tile == 0
    n_btiles = B_pad // batch_tile

    # --- layout plumbing: batch onto the lane axis, pad T and B ---
    # TODO(synk): fuse this transpose into the upstream emission producer.
    feats_t = jnp.transpose(feats, (0, 2, 1))                      # (T, M, B)
    mask_f = mask.astype(jnp.float32)                              # (T, B) dense 2-D
    pad_t, pad_b = T_pad - T, B_pad - B
    if pad_t or pad_b:
        feats_t = jnp.pad(feats_t, ((0, pad_t), (0, 0), (0, pad_b)))
        mask_f = jnp.pad(mask_f, ((0, pad_t), (0, pad_b)))         # mask=0 => passthrough

    # --- transition preprocessing hoisted fully out of the kernel ---
    trans_f32 = transition.astype(jnp.float32)
    exp_trans = jnp.exp(trans_f32)                                 # (M, M); -10000 rows/cols -> 0
    trans_end = trans_f32[end_idx, :].reshape(M, 1)                # (M, 1)

    kernel = functools.partial(
        _crf_forward_kernel, start_idx=start_idx, time_chunk=time_chunk,
        unroll=max(1, min(unroll, time_chunk)), precision=precision)

    out = pl.pallas_call(
        kernel,
        out_shape=jax.ShapeDtypeStruct((1, B_pad), jnp.float32),
        grid_spec=pltpu.PrefetchScalarGridSpec(
            num_scalar_prefetch=0,
            grid=(n_btiles, n_chunks),                 # (parallel batch, sequential time)
            in_specs=[
                pl.BlockSpec((time_chunk, M, batch_tile), lambda b, t: (t, 0, b)),  # feats
                pl.BlockSpec((time_chunk, batch_tile), lambda b, t: (t, b)),        # mask (2-D)
                pl.BlockSpec((M, M), lambda b, t: (0, 0)),                           # exp(trans)
                pl.BlockSpec((M, 1), lambda b, t: (0, 0)),                           # trans[END,:]
            ],
            out_specs=pl.BlockSpec((1, batch_tile), lambda b, t: (0, b)),
            scratch_shapes=[pltpu.VMEM((M, batch_tile), jnp.float32)],               # alpha carry
        ),
        compiler_params=pltpu.CompilerParams(
            dimension_semantics=("parallel", "arbitrary"),
            vmem_limit_bytes=32 * 1024 * 1024,
        ),
    )(feats_t, mask_f, exp_trans, trans_end)
    return out[0, :B]


def crf_forward_ref(feats, mask, transition, start_idx, end_idx):
    """Pure-JAX reference mirroring the PyTorch loop."""
    T, B, M = feats.shape
    alpha = jnp.full((B, M), -10000.0, jnp.float32).at[:, start_idx].set(0.0)

    def step(alpha, xs):
        feat, m_t = xs
        score = alpha[:, None, :] + transition[None, :, :] + feat[:, :, None]
        lse = jax.scipy.special.logsumexp(score, axis=-1)
        m = m_t[:, None]
        return jnp.where(m > 0, lse, alpha), None

    alpha, _ = jax.lax.scan(step, alpha, (feats.astype(jnp.float32),
                                          mask.astype(jnp.float32)))
    alpha = alpha + transition[end_idx][None, :]
    return jax.scipy.special.logsumexp(alpha, axis=-1)


if __name__ == "__main__":
    # tag set (includes START/END like the PyTorch module's tag2idx)
    tag2idx = {"O": 0, "B-PER": 1, "I-PER": 2, "B-LOC": 3, "I-LOC": 4,
               "B-ORG": 5, START_TAG: 6, END_TAG: 7}
    M = len(tag2idx)                 # tag_size = 8
    T, B = 8, 4                      # seq_len = 8, batch = 4
    start_idx = tag2idx[START_TAG]
    end_idx = tag2idx[END_TAG]

    key = jax.random.PRNGKey(0)
    k_trans, k_feats = jax.random.split(key)

    # deterministic "xavier_normal_" init: std = sqrt(2 / (fan_in + fan_out))
    std = float(np.sqrt(2.0 / (M + M)))
    transition = jax.random.normal(k_trans, (M, M), jnp.float32) * std
    transition = transition.at[start_idx, :].set(-10000.0)   # nothing goes INTO START
    transition = transition.at[:, end_idx].set(-10000.0)     # nothing comes FROM END

    feats = jax.random.normal(k_feats, (T, B, M), jnp.float32)

    # variable-length mask (first `len` steps valid per batch element)
    lengths = jnp.array([8, 6, 5, 3], jnp.int32)
    mask = (jnp.arange(T)[:, None] < lengths[None, :]).astype(jnp.float32)  # (T, B)

    scores = crf_forward(feats, mask, transition, start_idx, end_idx)
    scores = jax.block_until_ready(scores)

    ref = crf_forward_ref(feats, mask, transition, start_idx, end_idx)
    # Tolerance covers the exp->MXU-matmul->log reformulation (matmul rounding);
    # any semantic error (trans orientation, mask, START/END) is O(1) or larger.
    np.testing.assert_allclose(np.asarray(scores), np.asarray(ref),
                               rtol=2e-3, atol=2e-2)

    print("KERNEL_OK")
</pallas_src>

<mosaic_0001>
module attributes {stable_mosaic.version = 11 : i64} {
  func.func @_crf_forward_kernel(%arg0: i32, %arg1: i32, %arg2: memref<8x8x128xf32, #tpu.memory_space<vmem>>, %arg3: memref<8x128xf32, #tpu.memory_space<vmem>>, %arg4: memref<8x8xf32, #tpu.memory_space<vmem>>, %arg5: memref<8x1xf32, #tpu.memory_space<vmem>>, %arg6: memref<1x128xf32, #tpu.memory_space<vmem>>, %arg7: memref<8x128xf32, #tpu.memory_space<vmem>>) attributes {dimension_semantics = [#tpu.dimension_semantics<parallel>, #tpu.dimension_semantics<arbitrary>], iteration_bounds = array<i64: 1, 1>, scalar_prefetch = 0 : i64, scratch_operands = 1 : i64, tpu.core_type = #tpu.core_type<tc>, window_params = [{transform_indices = @transform_0, window_bounds = array<i64: 8, 8, 128>}, {transform_indices = @transform_1, window_bounds = array<i64: 8, 128>}, {pipeline_mode = #tpu.pipeline_mode<synchronous>, transform_indices = @transform_2, window_bounds = array<i64: 8, 8>}, {pipeline_mode = #tpu.pipeline_mode<synchronous>, transform_indices = @transform_3, window_bounds = array<i64: 8, 1>}, {transform_indices = @transform_4, window_bounds = array<i64: 1, 128>}]} {
    %c0_i32 = arith.constant 0 : i32
    %0 = arith.cmpi eq, %arg1, %c0_i32 : i32
    %1 = arith.extui %0 : i1 to i32
    %c0_i32_0 = arith.constant 0 : i32
    %2 = arith.cmpi ne, %1, %c0_i32_0 : i32
    scf.if %2 {
      %185 = tpu.iota {dimensions = array<i32: 0>} : vector<8x128xi32>
      %c6_i32_64 = arith.constant 6 : i32
      %186 = vector.broadcast %c6_i32_64 : i32 to vector<8x128xi32>
      %187 = arith.cmpi eq, %185, %186 : vector<8x128xi32>
      %cst_65 = arith.constant 0.000000e+00 : f32
      %cst_66 = arith.constant -1.000000e+04 : f32
      %188 = vector.broadcast %cst_65 : f32 to vector<8x128xf32>
      %189 = vector.broadcast %cst_66 : f32 to vector<8x128xf32>
      %190 = arith.select %187, %188, %189 : vector<8x128xi1>, vector<8x128xf32>
      %c0_67 = arith.constant 0 : index
      %c0_68 = arith.constant 0 : index
      %191 = vector.load %arg7[%c0_67, %c0_68] : memref<8x128xf32, #tpu.memory_space<vmem>>, vector<8x128xf32>
      tpu.vector_store %arg7[%c0_67, %c0_68], %190 {strides = array<i32>} : memref<8x128xf32, #tpu.memory_space<vmem>>, vector<8x128xf32>,
    } else {
    }
    %c0 = arith.constant 0 : index
    %c0_1 = arith.constant 0 : index
    %3 = vector.load %arg4[%c0, %c0_1] : memref<8x8xf32, #tpu.memory_space<vmem>>, vector<8x8xf32>
    %c0_2 = arith.constant 0 : index
    %c0_3 = arith.constant 0 : index
    %4 = vector.load %arg7[%c0_2, %c0_3] : memref<8x128xf32, #tpu.memory_space<vmem>>, vector<8x128xf32>
    %c0_i32_4 = arith.constant 0 : i32
    %5 = arith.index_cast %c0_i32_4 : i32 to index
    %c0_5 = arith.constant 0 : index
    %c0_6 = arith.constant 0 : index
    %6 = vector.load %arg2[%5, %c0_5, %c0_6] : memref<8x8x128xf32, #tpu.memory_space<vmem>>, vector<1x8x128xf32>
    %7 = vector.shape_cast %6 : vector<1x8x128xf32> to vector<8x128xf32>
    %8 = arith.index_cast %c0_i32_4 : i32 to index
    %c0_7 = arith.constant 0 : index
    %9 = vector.load %arg3[%8, %c0_7] : memref<8x128xf32, #tpu.memory_space<vmem>>, vector<1x128xf32>
    %cst = arith.constant dense<0xFF800000> : vector<128xf32>
    %10 = vector.multi_reduction <maximumf>, %4, %cst [0] : vector<8x128xf32> to vector<128xf32>
    %11 = vector.shape_cast %10 : vector<128xf32> to vector<1x128xf32>
    %12 = vector.broadcast %11 : vector<1x128xf32> to vector<8x128xf32>
    %13 = arith.subf %4, %12 : vector<8x128xf32>
    %14 = math.exp %13 : vector<8x128xf32>
    %cst_8 = arith.constant dense<0.000000e+00> : vector<8x128xf32>
    %15 = tpu.matmul %3, %14, %cst_8 {dimension_numbers = #tpu.dot_dimension_numbers<[1], [0], [0], [1], [0, 0, 1, 1], [], []>} : vector<8x8xf32>, vector<8x128xf32>, vector<8x128xf32> -> vector<8x128xf32>
    %16 = vector.broadcast %11 : vector<1x128xf32> to vector<8x128xf32>
    %17 = arith.addf %7, %16 : vector<8x128xf32>
    %cst_9 = arith.constant 9.99999991E-38 : f32
    %18 = vector.broadcast %cst_9 : f32 to vector<8x128xf32>
    %19 = arith.maximumf %15, %18 : vector<8x128xf32>
    %20 = math.log %19 : vector<8x128xf32>
    %21 = arith.addf %17, %20 : vector<8x128xf32>
    %cst_10 = arith.constant 0.000000e+00 : f32
    %22 = vector.broadcast %cst_10 : f32 to vector<1x128xf32>
    %23 = arith.cmpf ogt, %9, %22 : vector<1x128xf32>
    %24 = vector.shape_cast %23 : vector<1x128xi1> to vector<1x128xi1>
    %25 = vector.broadcast %24 : vector<1x128xi1> to vector<8x128xi1>
    %26 = arith.select %25, %21, %4 : vector<8x128xi1>, vector<8x128xf32>
    %c1_i32 = arith.constant 1 : i32
    %27 = arith.index_cast %c1_i32 : i32 to index
    %c0_11 = arith.constant 0 : index
    %c0_12 = arith.constant 0 : index
    %28 = vector.load %arg2[%27, %c0_11, %c0_12] : memref<8x8x128xf32, #tpu.memory_space<vmem>>, vector<1x8x128xf32>
    %29 = vector.shape_cast %28 : vector<1x8x128xf32> to vector<8x128xf32>
    %30 = arith.index_cast %c1_i32 : i32 to index
    %c0_13 = arith.constant 0 : index
    %31 = vector.load %arg3[%30, %c0_13] : memref<8x128xf32, #tpu.memory_space<vmem>>, vector<1x128xf32>
    %cst_14 = arith.constant dense<0xFF800000> : vector<128xf32>
    %32 = vector.multi_reduction <maximumf>, %26, %cst_14 [0] : vector<8x128xf32> to vector<128xf32>
    %33 = vector.shape_cast %32 : vector<128xf32> to vector<1x128xf32>
    %34 = vector.broadcast %33 : vector<1x128xf32> to vector<8x128xf32>
    %35 = arith.subf %26, %34 : vector<8x128xf32>
    %36 = math.exp %35 : vector<8x128xf32>
    %cst_15 = arith.constant dense<0.000000e+00> : vector<8x128xf32>
    %37 = tpu.matmul %3, %36, %cst_15 {dimension_numbers = #tpu.dot_dimension_numbers<[1], [0], [0], [1], [0, 0, 1, 1], [], []>} : vector<8x8xf32>, vector<8x128xf32>, vector<8x128xf32> -> vector<8x128xf32>
    %38 = vector.broadcast %33 : vector<1x128xf32> to vector<8x128xf32>
    %39 = arith.addf %29, %38 : vector<8x128xf32>
    %cst_16 = arith.constant 9.99999991E-38 : f32
    %40 = vector.broadcast %cst_16 : f32 to vector<8x128xf32>
    %41 = arith.maximumf %37, %40 : vector<8x128xf32>
    %42 = math.log %41 : vector<8x128xf32>
    %43 = arith.addf %39, %42 : vector<8x128xf32>
    %cst_17 = arith.constant 0.000000e+00 : f32
    %44 = vector.broadcast %cst_17 : f32 to vector<1x128xf32>
    %45 = arith.cmpf ogt, %31, %44 : vector<1x128xf32>
    %46 = vector.shape_cast %45 : vector<1x128xi1> to vector<1x128xi1>
    %47 = vector.broadcast %46 : vector<1x128xi1> to vector<8x128xi1>
    %48 = arith.select %47, %43, %26 : vector<8x128xi1>, vector<8x128xf32>
    %c2_i32 = arith.constant 2 : i32
    %49 = arith.index_cast %c2_i32 : i32 to index
    %c0_18 = arith.constant 0 : index
    %c0_19 = arith.constant 0 : index
    %50 = vector.load %arg2[%49, %c0_18, %c0_19] : memref<8x8x128xf32, #tpu.memory_space<vmem>>, vector<1x8x128xf32>
    %51 = vector.shape_cast %50 : vector<1x8x128xf32> to vector<8x128xf32>
    %52 = arith.index_cast %c2_i32 : i32 to index
    %c0_20 = arith.constant 0 : index
    %53 = vector.load %arg3[%52, %c0_20] : memref<8x128xf32, #tpu.memory_space<vmem>>, vector<1x128xf32>
    %cst_21 = arith.constant dense<0xFF800000> : vector<128xf32>
    %54 = vector.multi_reduction <maximumf>, %48, %cst_21 [0] : vector<8x128xf32> to vector<128xf32>
    %55 = vector.shape_cast %54 : vector<128xf32> to vector<1x128xf32>
    %56 = vector.broadcast %55 : vector<1x128xf32> to vector<8x128xf32>
    %57 = arith.subf %48, %56 : vector<8x128xf32>
    %58 = math.exp %57 : vector<8x128xf32>
    %cst_22 = arith.constant dense<0.000000e+00> : vector<8x128xf32>
    %59 = tpu.matmul %3, %58, %cst_22 {dimension_numbers = #tpu.dot_dimension_numbers<[1], [0], [0], [1], [0, 0, 1, 1], [], []>} : vector<8x8xf32>, vector<8x128xf32>, vector<8x128xf32> -> vector<8x128xf32>
    %60 = vector.broadcast %55 : vector<1x128xf32> to vector<8x128xf32>
    %61 = arith.addf %51, %60 : vector<8x128xf32>
    %cst_23 = arith.constant 9.99999991E-38 : f32
    %62 = vector.broadcast %cst_23 : f32 to vector<8x128xf32>
    %63 = arith.maximumf %59, %62 : vector<8x128xf32>
    %64 = math.log %63 : vector<8x128xf32>
    %65 = arith.addf %61, %64 : vector<8x128xf32>
    %cst_24 = arith.constant 0.000000e+00 : f32
    %66 = vector.broadcast %cst_24 : f32 to vector<1x128xf32>
    %67 = arith.cmpf ogt, %53, %66 : vector<1x128xf32>
    %68 = vector.shape_cast %67 : vector<1x128xi1> to vector<1x128xi1>
    %69 = vector.broadcast %68 : vector<1x128xi1> to vector<8x128xi1>
    %70 = arith.select %69, %65, %48 : vector<8x128xi1>, vector<8x128xf32>
    %c3_i32 = arith.constant 3 : i32
    %71 = arith.index_cast %c3_i32 : i32 to index
    %c0_25 = arith.constant 0 : index
    %c0_26 = arith.constant 0 : index
    %72 = vector.load %arg2[%71, %c0_25, %c0_26] : memref<8x8x128xf32, #tpu.memory_space<vmem>>, vector<1x8x128xf32>
    %73 = vector.shape_cast %72 : vector<1x8x128xf32> to vector<8x128xf32>
    %74 = arith.index_cast %c3_i32 : i32 to index
    %c0_27 = arith.constant 0 : index
    %75 = vector.load %arg3[%74, %c0_27] : memref<8x128xf32, #tpu.memory_space<vmem>>, vector<1x128xf32>
    %cst_28 = arith.constant dense<0xFF800000> : vector<128xf32>
    %76 = vector.multi_reduction <maximumf>, %70, %cst_28 [0] : vector<8x128xf32> to vector<128xf32>
    %77 = vector.shape_cast %76 : vector<128xf32> to vector<1x128xf32>
    %78 = vector.broadcast %77 : vector<1x128xf32> to vector<8x128xf32>
    %79 = arith.subf %70, %78 : vector<8x128xf32>
    %80 = math.exp %79 : vector<8x128xf32>
    %cst_29 = arith.constant dense<0.000000e+00> : vector<8x128xf32>
    %81 = tpu.matmul %3, %80, %cst_29 {dimension_numbers = #tpu.dot_dimension_numbers<[1], [0], [0], [1], [0, 0, 1, 1], [], []>} : vector<8x8xf32>, vector<8x128xf32>, vector<8x128xf32> -> vector<8x128xf32>
    %82 = vector.broadcast %77 : vector<1x128xf32> to vector<8x128xf32>
    %83 = arith.addf %73, %82 : vector<8x128xf32>
    %cst_30 = arith.constant 9.99999991E-38 : f32
    %84 = vector.broadcast %cst_30 : f32 to vector<8x128xf32>
    %85 = arith.maximumf %81, %84 : vector<8x128xf32>
    %86 = math.log %85 : vector<8x128xf32>
    %87 = arith.addf %83, %86 : vector<8x128xf32>
    %cst_31 = arith.constant 0.000000e+00 : f32
    %88 = vector.broadcast %cst_31 : f32 to vector<1x128xf32>
    %89 = arith.cmpf ogt, %75, %88 : vector<1x128xf32>
    %90 = vector.shape_cast %89 : vector<1x128xi1> to vector<1x128xi1>
    %91 = vector.broadcast %90 : vector<1x128xi1> to vector<8x128xi1>
    %92 = arith.select %91, %87, %70 : vector<8x128xi1>, vector<8x128xf32>
    %c4_i32 = arith.constant 4 : i32
    %93 = arith.index_cast %c4_i32 : i32 to index
    %c0_32 = arith.constant 0 : index
    %c0_33 = arith.constant 0 : index
    %94 = vector.load %arg2[%93, %c0_32, %c0_33] : memref<8x8x128xf32, #tpu.memory_space<vmem>>, vector<1x8x128xf32>
    %95 = vector.shape_cast %94 : vector<1x8x128xf32> to vector<8x128xf32>
    %96 = arith.index_cast %c4_i32 : i32 to index
    %c0_34 = arith.constant 0 : index
    %97 = vector.load %arg3[%96, %c0_34] : memref<8x128xf32, #tpu.memory_space<vmem>>, vector<1x128xf32>
    %cst_35 = arith.constant dense<0xFF800000> : vector<128xf32>
    %98 = vector.multi_reduction <maximumf>, %92, %cst_35 [0] : vector<8x128xf32> to vector<128xf32>
    %99 = vector.shape_cast %98 : vector<128xf32> to vector<1x128xf32>
    %100 = vector.broadcast %99 : vector<1x128xf32> to vector<8x128xf32>
    %101 = arith.subf %92, %100 : vector<8x128xf32>
    %102 = math.exp %101 : vector<8x128xf32>
    %cst_36 = arith.constant dense<0.000000e+00> : vector<8x128xf32>
    %103 = tpu.matmul %3, %102, %cst_36 {dimension_numbers = #tpu.dot_dimension_numbers<[1], [0], [0], [1], [0, 0, 1, 1], [], []>} : vector<8x8xf32>, vector<8x128xf32>, vector<8x128xf32> -> vector<8x128xf32>
    %104 = vector.broadcast %99 : vector<1x128xf32> to vector<8x128xf32>
    %105 = arith.addf %95, %104 : vector<8x128xf32>
    %cst_37 = arith.constant 9.99999991E-38 : f32
    %106 = vector.broadcast %cst_37 : f32 to vector<8x128xf32>
    %107 = arith.maximumf %103, %106 : vector<8x128xf32>
    %108 = math.log %107 : vector<8x128xf32>
    %109 = arith.addf %105, %108 : vector<8x128xf32>
    %cst_38 = arith.constant 0.000000e+00 : f32
    %110 = vector.broadcast %cst_38 : f32 to vector<1x128xf32>
    %111 = arith.cmpf ogt, %97, %110 : vector<1x128xf32>
    %112 = vector.shape_cast %111 : vector<1x128xi1> to vector<1x128xi1>
    %113 = vector.broadcast %112 : vector<1x128xi1> to vector<8x128xi1>
    %114 = arith.select %113, %109, %92 : vector<8x128xi1>, vector<8x128xf32>
    %c5_i32 = arith.constant 5 : i32
    %115 = arith.index_cast %c5_i32 : i32 to index
    %c0_39 = arith.constant 0 : index
    %c0_40 = arith.constant 0 : index
    %116 = vector.load %arg2[%115, %c0_39, %c0_40] : memref<8x8x128xf32, #tpu.memory_space<vmem>>, vector<1x8x128xf32>
    %117 = vector.shape_cast %116 : vector<1x8x128xf32> to vector<8x128xf32>
    %118 = arith.index_cast %c5_i32 : i32 to index
    %c0_41 = arith.constant 0 : index
    %119 = vector.load %arg3[%118, %c0_41] : memref<8x128xf32, #tpu.memory_space<vmem>>, vector<1x128xf32>
    %cst_42 = arith.constant dense<0xFF800000> : vector<128xf32>
    %120 = vector.multi_reduction <maximumf>, %114, %cst_42 [0] : vector<8x128xf32> to vector<128xf32>
    %121 = vector.shape_cast %120 : vector<128xf32> to vector<1x128xf32>
    %122 = vector.broadcast %121 : vector<1x128xf32> to vector<8x128xf32>
    %123 = arith.subf %114, %122 : vector<8x128xf32>
    %124 = math.exp %123 : vector<8x128xf32>
    %cst_43 = arith.constant dense<0.000000e+00> : vector<8x128xf32>
    %125 = tpu.matmul %3, %124, %cst_43 {dimension_numbers = #tpu.dot_dimension_numbers<[1], [0], [0], [1], [0, 0, 1, 1], [], []>} : vector<8x8xf32>, vector<8x128xf32>, vector<8x128xf32> -> vector<8x128xf32>
    %126 = vector.broadcast %121 : vector<1x128xf32> to vector<8x128xf32>
    %127 = arith.addf %117, %126 : vector<8x128xf32>
    %cst_44 = arith.constant 9.99999991E-38 : f32
    %128 = vector.broadcast %cst_44 : f32 to vector<8x128xf32>
    %129 = arith.maximumf %125, %128 : vector<8x128xf32>
    %130 = math.log %129 : vector<8x128xf32>
    %131 = arith.addf %127, %130 : vector<8x128xf32>
    %cst_45 = arith.constant 0.000000e+00 : f32
    %132 = vector.broadcast %cst_45 : f32 to vector<1x128xf32>
    %133 = arith.cmpf ogt, %119, %132 : vector<1x128xf32>
    %134 = vector.shape_cast %133 : vector<1x128xi1> to vector<1x128xi1>
    %135 = vector.broadcast %134 : vector<1x128xi1> to vector<8x128xi1>
    %136 = arith.select %135, %131, %114 : vector<8x128xi1>, vector<8x128xf32>
    %c6_i32 = arith.constant 6 : i32
    %137 = arith.index_cast %c6_i32 : i32 to index
    %c0_46 = arith.constant 0 : index
    %c0_47 = arith.constant 0 : index
    %138 = vector.load %arg2[%137, %c0_46, %c0_47] : memref<8x8x128xf32, #tpu.memory_space<vmem>>, vector<1x8x128xf32>
    %139 = vector.shape_cast %138 : vector<1x8x128xf32> to vector<8x128xf32>
    %140 = arith.index_cast %c6_i32 : i32 to index
    %c0_48 = arith.constant 0 : index
    %141 = vector.load %arg3[%140, %c0_48] : memref<8x128xf32, #tpu.memory_space<vmem>>, vector<1x128xf32>
    %cst_49 = arith.constant dense<0xFF800000> : vector<128xf32>
    %142 = vector.multi_reduction <maximumf>, %136, %cst_49 [0] : vector<8x128xf32> to vector<128xf32>
    %143 = vector.shape_cast %142 : vector<128xf32> to vector<1x128xf32>
    %144 = vector.broadcast %143 : vector<1x128xf32> to vector<8x128xf32>
    %145 = arith.subf %136, %144 : vector<8x128xf32>
    %146 = math.exp %145 : vector<8x128xf32>
    %cst_50 = arith.constant dense<0.000000e+00> : vector<8x128xf32>
    %147 = tpu.matmul %3, %146, %cst_50 {dimension_numbers = #tpu.dot_dimension_numbers<[1], [0], [0], [1], [0, 0, 1, 1], [], []>} : vector<8x8xf32>, vector<8x128xf32>, vector<8x128xf32> -> vector<8x128xf32>
    %148 = vector.broadcast %143 : vector<1x128xf32> to vector<8x128xf32>
    %149 = arith.addf %139, %148 : vector<8x128xf32>
    %cst_51 = arith.constant 9.99999991E-38 : f32
    %150 = vector.broadcast %cst_51 : f32 to vector<8x128xf32>
    %151 = arith.maximumf %147, %150 : vector<8x128xf32>
    %152 = math.log %151 : vector<8x128xf32>
    %153 = arith.addf %149, %152 : vector<8x128xf32>
    %cst_52 = arith.constant 0.000000e+00 : f32
    %154 = vector.broadcast %cst_52 : f32 to vector<1x128xf32>
    %155 = arith.cmpf ogt, %141, %154 : vector<1x128xf32>
    %156 = vector.shape_cast %155 : vector<1x128xi1> to vector<1x128xi1>
    %157 = vector.broadcast %156 : vector<1x128xi1> to vector<8x128xi1>
    %158 = arith.select %157, %153, %136 : vector<8x128xi1>, vector<8x128xf32>
    %c7_i32 = arith.constant 7 : i32
    %159 = arith.index_cast %c7_i32 : i32 to index
    %c0_53 = arith.constant 0 : index
    %c0_54 = arith.constant 0 : index
    %160 = vector.load %arg2[%159, %c0_53, %c0_54] : memref<8x8x128xf32, #tpu.memory_space<vmem>>, vector<1x8x128xf32>
    %161 = vector.shape_cast %160 : vector<1x8x128xf32> to vector<8x128xf32>
    %162 = arith.index_cast %c7_i32 : i32 to index
    %c0_55 = arith.constant 0 : index
    %163 = vector.load %arg3[%162, %c0_55] : memref<8x128xf32, #tpu.memory_space<vmem>>, vector<1x128xf32>
    %cst_56 = arith.constant dense<0xFF800000> : vector<128xf32>
    %164 = vector.multi_reduction <maximumf>, %158, %cst_56 [0] : vector<8x128xf32> to vector<128xf32>
    %165 = vector.shape_cast %164 : vector<128xf32> to vector<1x128xf32>
    %166 = vector.broadcast %165 : vector<1x128xf32> to vector<8x128xf32>
    %167 = arith.subf %158, %166 : vector<8x128xf32>
    %168 = math.exp %167 : vector<8x128xf32>
    %cst_57 = arith.constant dense<0.000000e+00> : vector<8x128xf32>
    %169 = tpu.matmul %3, %168, %cst_57 {dimension_numbers = #tpu.dot_dimension_numbers<[1], [0], [0], [1], [0, 0, 1, 1], [], []>} : vector<8x8xf32>, vector<8x128xf32>, vector<8x128xf32> -> vector<8x128xf32>
    %170 = vector.broadcast %165 : vector<1x128xf32> to vector<8x128xf32>
    %171 = arith.addf %161, %170 : vector<8x128xf32>
    %cst_58 = arith.constant 9.99999991E-38 : f32
    %172 = vector.broadcast %cst_58 : f32 to vector<8x128xf32>
    %173 = arith.maximumf %169, %172 : vector<8x128xf32>
    %174 = math.log %173 : vector<8x128xf32>
    %175 = arith.addf %171, %174 : vector<8x128xf32>
    %cst_59 = arith.constant 0.000000e+00 : f32
    %176 = vector.broadcast %cst_59 : f32 to vector<1x128xf32>
    %177 = arith.cmpf ogt, %163, %176 : vector<1x128xf32>
    %178 = vector.shape_cast %177 : vector<1x128xi1> to vector<1x128xi1>
    %179 = vector.broadcast %178 : vector<1x128xi1> to vector<8x128xi1>
    %180 = arith.select %179, %175, %158 : vector<8x128xi1>, vector<8x128xf32>
    %c8_i32 = arith.constant 8 : i32
    %c0_60 = arith.constant 0 : index
    %c0_61 = arith.constant 0 : index
    %181 = vector.load %arg7[%c0_60, %c0_61] : memref<8x128xf32, #tpu.memory_space<vmem>>, vector<8x128xf32>
    tpu.vector_store %arg7[%c0_60, %c0_61], %180 {strides = array<i32>} : memref<8x128xf32, #tpu.memory_space<vmem>>, vector<8x128xf32>,
    %c0_i32_62 = arith.constant 0 : i32
    %182 = arith.cmpi eq, %arg1, %c0_i32_62 : i32
    %183 = arith.extui %182 : i1 to i32
    %c0_i32_63 = arith.constant 0 : i32
    %184 = arith.cmpi ne, %183, %c0_i32_63 : i32
    scf.if %184 {
      %c0_64 = arith.constant 0 : index
      %c0_65 = arith.constant 0 : index
      %185 = vector.load %arg7[%c0_64, %c0_65] : memref<8x128xf32, #tpu.memory_space<vmem>>, vector<8x128xf32>
      %c0_66 = arith.constant 0 : index
      %c0_67 = arith.constant 0 : index
      %186 = vector.load %arg5[%c0_66, %c0_67] : memref<8x1xf32, #tpu.memory_space<vmem>>, vector<8x1xf32>
      %187 = vector.broadcast %186 : vector<8x1xf32> to vector<8x128xf32>
      %188 = arith.addf %185, %187 : vector<8x128xf32>
      %cst_68 = arith.constant dense<0xFF800000> : vector<128xf32>
      %189 = vector.multi_reduction <maximumf>, %188, %cst_68 [0] : vector<8x128xf32> to vector<128xf32>
      %190 = vector.shape_cast %189 : vector<128xf32> to vector<1x128xf32>
      %191 = vector.broadcast %190 : vector<1x128xf32> to vector<8x128xf32>
      %192 = arith.subf %188, %191 : vector<8x128xf32>
      %193 = math.exp %192 : vector<8x128xf32>
      %cst_69 = arith.constant dense<0.000000e+00> : vector<128xf32>
      %194 = vector.multi_reduction <add>, %193, %cst_69 [0] : vector<8x128xf32> to vector<128xf32>
      %195 = vector.shape_cast %194 : vector<128xf32> to vector<1x128xf32>
      %196 = math.log %195 : vector<1x128xf32>
      %197 = arith.addf %190, %196 : vector<1x128xf32>
      %c0_70 = arith.constant 0 : index
      %c0_71 = arith.constant 0 : index
      %198 = vector.load %arg6[%c0_70, %c0_71] : memref<1x128xf32, #tpu.memory_space<vmem>>, vector<1x128xf32>
      tpu.vector_store %arg6[%c0_70, %c0_71], %197 {strides = array<i32>} : memref<1x128xf32, #tpu.memory_space<vmem>>, vector<1x128xf32>,
    } else {
    }
    return
  }
  func.func @transform_0(%arg0: i32, %arg1: i32) -> (i32, i32, i32) {
    %c0_i32 = arith.constant 0 : i32
    %c0_i32_0 = arith.constant 0 : i32
    return %arg1, %c0_i32, %arg0 : i32, i32, i32
  }
  func.func @transform_1(%arg0: i32, %arg1: i32) -> (i32, i32) {
    %c0_i32 = arith.constant 0 : i32
    return %arg1, %arg0 : i32, i32
  }
  func.func @transform_2(%arg0: i32, %arg1: i32) -> (i32, i32) {
    %c0_i32 = arith.constant 0 : i32
    %c0_i32_0 = arith.constant 0 : i32
    %c0_i32_1 = arith.constant 0 : i32
    return %c0_i32, %c0_i32_0 : i32, i32
  }
  func.func @transform_3(%arg0: i32, %arg1: i32) -> (i32, i32) {
    %c0_i32 = arith.constant 0 : i32
    %c0_i32_0 = arith.constant 0 : i32
    %c0_i32_1 = arith.constant 0 : i32
    return %c0_i32, %c0_i32_0 : i32, i32
  }
  func.func @transform_4(%arg0: i32, %arg1: i32) -> (i32, i32) {
    %c0_i32 = arith.constant 0 : i32
    %c0_i32_0 = arith.constant 0 : i32
    return %c0_i32, %arg0 : i32, i32
  }
}

</mosaic_0001>

<bundles_post_ra>
// kernel: tpu_custom_call.1
= control target key start
LH: loop header
LB: loop body
LE: loop exit
PB: predicated region body
PF: predicated region fallthrough
CT: control target
= control target key end

     0   :  { %9 = vsyncpa [#allocation4], 0  ;;  %s1157_s0 = inlined_call_operand.hbm [shape: f32[8,8,128], index: 0, kind: input, shape index: {}]   ;;  %s1158_s1 = inlined_call_operand.vmem [shape: f32[8,128], index: 1, kind: input, shape index: {}]   ;;  %s1159_s2 = inlined_call_operand.vmem [shape: f32[8,8], index: 2, kind: input, shape index: {}]   ;;  %s1160_s3 = inlined_call_operand.vmem [shape: f32[8,1], index: 3, kind: input, shape index: {}]   ;;  %s1161_s4 = inlined_call_operand.hbm [shape: f32[1,128], index: 4, kind: output, shape index: {}]  }
   0x1   :  { %10 = vsyncpa [#allocation5], 0  ;;  %s1009_s15 = smov [#allocation3]   ;;  %s961_s19 = scalar_lea.hbm %s1157_s0, 1024 }
   0x2   :  { %s16_s16 = sshll.u32 %s1009_s15, 4  ;;  %p962_p0 = scmp.ne.s32.totalorder %s1157_s0, %s961_s19  ;;  %s17_s16 = int_to_ptr.vmem [resolvable:$true] %s16_s16 }
   0x3   :  { %p965_p1 = scmp.lt.u32.totalorder %s961_s19, %s1157_s0 }
   0x5   :  { %p967_p2 = pnand %p965_p1, %p962_p0 }
   0x7   :  { %970 = shalt.err (!%p967_p2)
}
   0x8   :  { %s971_s24 = scalar_lea.vmem %s17_s16, 1024  ;;  %p976_p4 = scmp.lt.s32.totalorder %s17_s16, %s17_s16 }
   0x9   :  { %p972_p3 = scmp.ne.s32.totalorder %s17_s16, %s971_s24  ;;  %p977_p5 = scmp.lt.s32.totalorder %s971_s24, %s971_s24 }
   0xb   :  { %p978_p6 = por %p977_p5, %p976_p4 }
   0xd   :  { %p979_p7 = pnand %p978_p6, %p972_p3 }
   0xf   :  { %982 = shalt.err (!%p979_p7)
}
  0x10   :  { %s1010_s25 = smov 128   ;;  %s1011_s26 = smov 8  }
  0x11   :  { %22 = dma.hbm_to_vmem [thread:$0]  %s1157_s0, 1024, %s17_s16, [#allocation4], %s1010_s25, %s1010_s25, %s1011_s26  }
  0x12   :  { %1005 = dma.done.wait [#allocation4], 1024  }
  0x13   :  { %1006 = vsyncadd [#allocation4], 4294966272  ;;  %v36_v0 = vlaneseq  ;;  %v1012_v1 = vmov 0.0   ;;  %vm1013_vm0 = vmmov 0   ;;  %v1014_v3 = vmov -10000.0   ;;  %v1063_v13 = vld [vmem:[%s1159_s2] sm:$0xff] }
  0x14   :  { %876 = vmatprep.subr.mxu0 %v1012_v1  ;;  %878 = vmatprep.mubr.msk.f32.mxu0 %vm1013_vm0, %v1012_v1  ;;  %vm54_vm2 = vcmask 64512   ;;  %v1015_v15 = vmov 0   ;;  %v44_v19 = vld [vmem:[%s1158_s1] sm:$0x1]  ;;  %v143_v41 = vld [vmem:[%s1158_s1 + $0x1] sm:$0x1] }
  0x15   :  { %v37_v2 = vshrl.u32 %v36_v0, 7  ;;  %881 = vmatprep.subr.mxu1 %v1012_v1  ;;  %883 = vmatprep.mubr.msk.f32.mxu1 %vm1013_vm0, %v1012_v1  ;;  %vm133_vm3 = vcmp.gt.f32.partialorder %v44_v19, 0.0  ;;  %v43_v22 = vld [vmem:[#allocation3] sm:$0xff]  ;;  %vm228_vm5 = vcmp.gt.f32.partialorder %v143_v41, 0.0  ;;  %v142_v43 = vld [vmem:[#allocation3 + $0x8] sm:$0xff]  ;;  %v237_v0 = vld [vmem:[#allocation3 + $0x10] sm:$0xff] }
  0x16   :  { %924 = vset.pattern.permute.xlu0 %v1015_v15  ;;  %v134_v21 = vsel %vm133_vm3, 1, %v1015_v15  ;;  %v229_v42 = vsel %vm228_vm5, 1, %v1015_v15  ;;  %v238_v62 = vld [vmem:[%s1158_s1 + $0x2] sm:$0x1] }
  0x17   :  { %vm38_vm1 = vcmp.eq.s32.totalorder %v37_v2, 6  ;;  %v1074_v20 = vsub.s32 0, %v37_v2  ;;  %vm323_vm7 = vcmp.gt.f32.partialorder %v238_v62, 0.0 }
  0x18   :  { %v39_v4 = vsel %vm38_vm1, 0.0, %v1014_v3  ;;  %v324_v63 = vsel %vm323_vm7, 1, %v1015_v15 }
  0x19   :  { %v45_v5 = vrot.slane %v39_v4, 4  ;;  %v138_v23 = vrot.slane %v134_v21, %v1074_v20  ;;  %v233_v44 = vrot.slane %v229_v42, %v1074_v20  ;;  %v328_v2 = vrot.slane %v324_v63, %v1074_v20 }
  0x1b   :  { %v46_v6 = vmax.f32 %v39_v4, %v45_v5  ;;  %vm139_vm4 = vcmp.eq.s32.totalorder %v138_v23, 1  ;;  %vm234_vm6 = vcmp.eq.s32.totalorder %v233_v44, 1  ;;  %vm329_vm8 = vcmp.eq.s32.totalorder %v328_v2, 1  ;;  %v333_v23 = vld [vmem:[%s1158_s1 + $0x3] sm:$0x1] }
  0x1c   :  { %vm418_vm9 = vcmp.gt.f32.partialorder %v333_v23, 0.0  ;;  %v428_v44 = vld [vmem:[%s1158_s1 + $0x4] sm:$0x1]  ;;  %v523_v2 = vld [vmem:[%s1158_s1 + $0x5] sm:$0x1] }
  0x1d   :  { %v47_v7 = vrot.slane %v46_v6, 2  ;;  %vm513_vm11 = vcmp.gt.f32.partialorder %v428_v44, 0.0  ;;  %vm608_vm13 = vcmp.gt.f32.partialorder %v523_v2, 0.0 }
  0x1f   :  { %v48_v8 = vmax.f32 %v46_v6, %v47_v7 }
  0x21   :  { %v49_v9 = vrot.slane %v48_v8, 1 }
  0x23   :  { %v50_v10 = vmax.f32 %v48_v8, %v49_v9 }
  0x25   :  { %v51_v11 = vsub.f32 %v39_v4, %v50_v10  ;;  %v128_v24 = vadd.f32 %v50_v10, %v43_v22 }
  0x27   :  { %v52_v12 = vmul.f32 1.442695, %v51_v11 }
  0x29   :  { %925 = vpow2.f32 %v52_v12 }
  0x33   :  { %v926_v14 = vpop.eup %925 }
  0x34   :  { %877 = vmatpush3.msra.mxu0 %v926_v14 }
  0x35   :  { %879 = vmatmul.mubr.msk.f32.vlgmr.msra.gmra.mrb[0].mxu0 %vm54_vm2, %v1063_v13  ;;  %886 = vmatprep.subr.mxu0 %v1012_v1 }
  0x36   :  { %888 = vmatprep.mubr.msk.f32.mxu0 %vm1013_vm0, %v1012_v1 }
 0x108   :  { %v124_v16 = vpop.f32.mrb[0].mxu0 }
 0x109   :  { %v129_v17 = vmax.f32 %v124_v16, 1e-37  ;;  %v880_v18 = vpop.f32.mrb[1].mxu0 }
 0x10b   :  { %927 = vlog2.f32 %v129_v17 }
 0x115   :  { %v928_v25 = vpop.eup %927 }
 0x116   :  { %v131_v26 = vmul.f32 0.6931472, %v928_v25  ;;  %v332_v25 = vld [vmem:[#allocation3 + $0x18] sm:$0xff] }
 0x118   :  { %v132_v27 = vadd.f32 %v131_v26, %v128_v24  ;;  %v419_v24 = vsel %vm418_vm9, 1, %v1015_v15 }
 0x119   :  { %v423_v26 = vrot.slane %v419_v24, %v1074_v20 }
 0x11a   :  { %v140_v28 = vsel %vm139_vm4, %v132_v27, %v39_v4 }
 0x11b   :  { %v144_v29 = vrot.slane %v140_v28, 4  ;;  %vm424_vm10 = vcmp.eq.s32.totalorder %v423_v26, 1  ;;  %v618_v26 = vld [vmem:[%s1158_s1 + $0x6] sm:$0x1] }
 0x11c   :  { %vm703_vm15 = vcmp.gt.f32.partialorder %v618_v26, 0.0 }
 0x11d   :  { %v145_v30 = vmax.f32 %v140_v28, %v144_v29 }
 0x11f   :  { %v146_v31 = vrot.slane %v145_v30, 2 }
 0x121   :  { %v147_v32 = vmax.f32 %v145_v30, %v146_v31 }
 0x123   :  { %v148_v33 = vrot.slane %v147_v32, 1 }
 0x125   :  { %v149_v34 = vmax.f32 %v147_v32, %v148_v33 }
 0x127   :  { %v150_v35 = vsub.f32 %v140_v28, %v149_v34  ;;  %v223_v46 = vadd.f32 %v149_v34, %v142_v43 }
 0x129   :  { %v151_v36 = vmul.f32 1.442695, %v150_v35 }
 0x12b   :  { %929 = vpow2.f32 %v151_v36 }
 0x135   :  { %v930_v37 = vpop.eup %929 }
 0x136   :  { %882 = vmatpush3.msra.mxu1 %v930_v37 }
 0x137   :  { %884 = vmatmul.mubr.msk.f32.vlgmr.msra.gmra.mrb[0].mxu1 %vm54_vm2, %v1063_v13  ;;  %891 = vmatprep.subr.mxu1 %v1012_v1 }
 0x138   :  { %893 = vmatprep.mubr.msk.f32.mxu1 %vm1013_vm0, %v1012_v1 }
 0x20a   :  { %v219_v38 = vpop.f32.mrb[0].mxu1 }
 0x20b   :  { %v224_v39 = vmax.f32 %v219_v38, 1e-37  ;;  %v885_v40 = vpop.f32.mrb[1].mxu1 }
 0x20d   :  { %931 = vlog2.f32 %v224_v39 }
 0x217   :  { %v932_v45 = vpop.eup %931 }
 0x218   :  { %v226_v47 = vmul.f32 0.6931472, %v932_v45  ;;  %v514_v45 = vsel %vm513_vm11, 1, %v1015_v15 }
 0x21a   :  { %v227_v48 = vadd.f32 %v226_v47, %v223_v46  ;;  %v427_v46 = vld [vmem:[#allocation3 + $0x20] sm:$0xff]  ;;  %v518_v47 = vrot.slane %v514_v45, %v1074_v20 }
 0x21c   :  { %v235_v49 = vsel %vm234_vm6, %v227_v48, %v140_v28  ;;  %vm519_vm12 = vcmp.eq.s32.totalorder %v518_v47, 1  ;;  %v713_v47 = vld [vmem:[%s1158_s1 + $0x7] sm:$0x1]  ;;  %s1016_s1 = smov [#allocation6]  }
 0x21d   :  { %v239_v50 = vrot.slane %v235_v49, 4  ;;  %vm798_vm1 = vcmp.gt.f32.partialorder %v713_v47, 0.0  ;;  %s843_s20 = sshll.u32 %s1016_s1, 4  ;;  %s844_s20 = int_to_ptr.vmem [resolvable:$true] %s843_s20 }
 0x21e   :  { %s983_s21 = scalar_lea.vmem %s844_s20, 16  ;;  %s987_s22 = scalar_lea.vmem %s844_s20, 32 }
 0x21f   :  { %v240_v51 = vmax.f32 %v235_v49, %v239_v50  ;;  %p984_p8 = scmp.ne.s32.totalorder %s844_s20, %s983_s21  ;;  %p988_p9 = scmp.lt.s32.totalorder %s844_s20, %s844_s20 }
 0x220   :  { %p989_p10 = scmp.lt.s32.totalorder %s987_s22, %s983_s21 }
 0x221   :  { %v241_v52 = vrot.slane %v240_v51, 2 }
 0x222   :  { %p990_p11 = por %p989_p10, %p988_p9 }
 0x223   :  { %v242_v53 = vmax.f32 %v240_v51, %v241_v52 }
 0x224   :  { %p991_p12 = pnand %p990_p11, %p984_p8 }
 0x225   :  { %v243_v54 = vrot.slane %v242_v53, 1 }
 0x227   :  { %v244_v55 = vmax.f32 %v242_v53, %v243_v54 }
 0x229   :  { %v245_v56 = vsub.f32 %v235_v49, %v244_v55  ;;  %v318_v4 = vadd.f32 %v244_v55, %v237_v0 }
 0x22b   :  { %v246_v57 = vmul.f32 1.442695, %v245_v56 }
 0x22d   :  { %933 = vpow2.f32 %v246_v57 }
 0x237   :  { %v934_v58 = vpop.eup %933 }
 0x238   :  { %887 = vmatpush3.msra.mxu0 %v934_v58 }
 0x239   :  { %889 = vmatmul.mubr.msk.f32.vlgmr.msra.gmra.mrb[2].mxu0 %vm54_vm2, %v1063_v13  ;;  %896 = vmatprep.subr.mxu0 %v1012_v1 }
 0x23a   :  { %898 = vmatprep.mubr.msk.f32.mxu0 %vm1013_vm0, %v1012_v1 }
 0x30c   :  { %v314_v59 = vpop.f32.mrb[2].mxu0 }
 0x30d   :  { %v319_v60 = vmax.f32 %v314_v59, 1e-37  ;;  %v890_v61 = vpop.f32.mrb[3].mxu0 }
 0x30f   :  { %935 = vlog2.f32 %v319_v60 }
 0x319   :  { %v936_v3 = vpop.eup %935 }
 0x31a   :  { %v321_v5 = vmul.f32 0.6931472, %v936_v3  ;;  %v609_v3 = vsel %vm608_vm13, 1, %v1015_v15 }
 0x31c   :  { %v322_v6 = vadd.f32 %v321_v5, %v318_v4  ;;  %v522_v4 = vld [vmem:[#allocation3 + $0x28] sm:$0xff]  ;;  %v613_v5 = vrot.slane %v609_v3, %v1074_v20 }
 0x31e   :  { %v330_v7 = vsel %vm329_vm8, %v322_v6, %v235_v49  ;;  %vm614_vm14 = vcmp.eq.s32.totalorder %v613_v5, 1 }
 0x31f   :  { %v334_v8 = vrot.slane %v330_v7, 4 }
 0x321   :  { %v335_v9 = vmax.f32 %v330_v7, %v334_v8 }
 0x323   :  { %v336_v10 = vrot.slane %v335_v9, 2 }
 0x325   :  { %v337_v11 = vmax.f32 %v335_v9, %v336_v10 }
 0x327   :  { %v338_v12 = vrot.slane %v337_v11, 1 }
 0x329   :  { %v339_v14 = vmax.f32 %v337_v11, %v338_v12 }
 0x32b   :  { %v340_v16 = vsub.f32 %v330_v7, %v339_v14  ;;  %v413_v28 = vadd.f32 %v339_v14, %v332_v25 }
 0x32d   :  { %v341_v17 = vmul.f32 1.442695, %v340_v16 }
 0x32f   :  { %937 = vpow2.f32 %v341_v17 }
 0x339   :  { %v938_v18 = vpop.eup %937 }
 0x33a   :  { %892 = vmatpush3.msra.mxu1 %v938_v18 }
 0x33b   :  { %894 = vmatmul.mubr.msk.f32.vlgmr.msra.gmra.mrb[2].mxu1 %vm54_vm2, %v1063_v13  ;;  %901 = vmatprep.subr.mxu1 %v1012_v1 }
 0x33c   :  { %903 = vmatprep.mubr.msk.f32.mxu1 %vm1013_vm0, %v1012_v1 }
 0x40e   :  { %v409_v19 = vpop.f32.mrb[2].mxu1 }
 0x40f   :  { %v414_v21 = vmax.f32 %v409_v19, 1e-37  ;;  %v895_v22 = vpop.f32.mrb[3].mxu1 }
 0x410   :  { %v811_v22 = vld [vmem:[%s1160_s3] sm:$0xff] }
 0x411   :  { %939 = vlog2.f32 %v414_v21  ;;  %814 = vperm.xlu0 %924, %v811_v22  }
 0x41b   :  { %v940_v27 = vpop.eup %939 }
 0x41c   :  { %v416_v29 = vmul.f32 0.6931472, %v940_v27  ;;  %v704_v27 = vsel %vm703_vm15, 1, %v1015_v15 }
 0x41e   :  { %v417_v30 = vadd.f32 %v416_v29, %v413_v28  ;;  %v617_v28 = vld [vmem:[#allocation3 + $0x30] sm:$0xff]  ;;  %v708_v29 = vrot.slane %v704_v27, %v1074_v20 }
 0x420   :  { %v425_v31 = vsel %vm424_vm10, %v417_v30, %v330_v7 }
 0x421   :  { %v429_v32 = vrot.slane %v425_v31, 4 }
 0x423   :  { %v430_v33 = vmax.f32 %v425_v31, %v429_v32 }
 0x425   :  { %v431_v34 = vrot.slane %v430_v33, 2 }
 0x427   :  { %v432_v35 = vmax.f32 %v430_v33, %v431_v34 }
 0x429   :  { %v433_v36 = vrot.slane %v432_v35, 1 }
 0x42b   :  { %v434_v37 = vmax.f32 %v432_v35, %v433_v36 }
 0x42d   :  { %v435_v38 = vsub.f32 %v425_v31, %v434_v37  ;;  %v508_v49 = vadd.f32 %v434_v37, %v427_v46 }
 0x42f   :  { %v436_v39 = vmul.f32 1.442695, %v435_v38 }
 0x431   :  { %941 = vpow2.f32 %v436_v39 }
 0x43b   :  { %v942_v40 = vpop.eup %941 }
 0x43c   :  { %897 = vmatpush3.msra.mxu0 %v942_v40 }
 0x43d   :  { %899 = vmatmul.mubr.msk.f32.vlgmr.msra.gmra.mrb[4].mxu0 %vm54_vm2, %v1063_v13  ;;  %906 = vmatprep.subr.mxu0 %v1012_v1 }
 0x43e   :  { %908 = vmatprep.mubr.msk.f32.mxu0 %vm1013_vm0, %v1012_v1 }
 0x510   :  { %v504_v41 = vpop.f32.mrb[4].mxu0 }
 0x511   :  { %v509_v42 = vmax.f32 %v504_v41, 1e-37  ;;  %v900_v43 = vpop.f32.mrb[5].mxu0 }
 0x513   :  { %943 = vlog2.f32 %v509_v42 }
 0x51d   :  { %v944_v48 = vpop.eup %943 }
 0x51e   :  { %v511_v50 = vmul.f32 0.6931472, %v944_v48  ;;  %v799_v48 = vsel %vm798_vm1, 1, %v1015_v15 }
 0x520   :  { %v512_v51 = vadd.f32 %v511_v50, %v508_v49  ;;  %v712_v49 = vld [vmem:[#allocation3 + $0x38] sm:$0xff]  ;;  %v803_v50 = vrot.slane %v799_v48, %v1074_v20 }
 0x522   :  { %v520_v52 = vsel %vm519_vm12, %v512_v51, %v425_v31  ;;  %vm804_vm3 = vcmp.eq.s32.totalorder %v803_v50, 1 }
 0x523   :  { %v524_v53 = vrot.slane %v520_v52, 4 }
 0x525   :  { %v525_v54 = vmax.f32 %v520_v52, %v524_v53 }
 0x527   :  { %v526_v55 = vrot.slane %v525_v54, 2 }
 0x529   :  { %v527_v56 = vmax.f32 %v525_v54, %v526_v55 }
 0x52b   :  { %v528_v57 = vrot.slane %v527_v56, 1 }
 0x52d   :  { %v529_v58 = vmax.f32 %v527_v56, %v528_v57 }
 0x52f   :  { %v530_v59 = vsub.f32 %v520_v52, %v529_v58  ;;  %v603_v7 = vadd.f32 %v529_v58, %v522_v4 }
 0x531   :  { %v531_v60 = vmul.f32 1.442695, %v530_v59 }
 0x533   :  { %945 = vpow2.f32 %v531_v60 }
 0x53d   :  { %v946_v61 = vpop.eup %945 }
 0x53e   :  { %902 = vmatpush3.msra.mxu1 %v946_v61 }
 0x53f   :  { %904 = vmatmul.mubr.msk.f32.vlgmr.msra.gmra.mrb[4].mxu1 %vm54_vm2, %v1063_v13  ;;  %911 = vmatprep.subr.mxu1 %v1012_v1 }
 0x540   :  { %913 = vmatprep.mubr.msk.f32.mxu1 %vm1013_vm0, %v1012_v1  ;;  %vm709_vm0 = vcmp.eq.s32.totalorder %v708_v29, 1 }
 0x612   :  { %v599_v62 = vpop.f32.mrb[4].mxu1 }
 0x613   :  { %v604_v63 = vmax.f32 %v599_v62, 1e-37  ;;  %v905_v0 = vpop.f32.mrb[5].mxu1 }
 0x615   :  { %947 = vlog2.f32 %v604_v63 }
 0x61f   :  { %v948_v6 = vpop.eup %947 }
 0x620   :  { %v606_v8 = vmul.f32 0.6931472, %v948_v6 }
 0x622   :  { %v607_v9 = vadd.f32 %v606_v8, %v603_v7 }
 0x624   :  { %v615_v1 = vsel %vm614_vm14, %v607_v9, %v520_v52 }
 0x625   :  { %v619_v10 = vrot.slane %v615_v1, 4 }
 0x627   :  { %v620_v11 = vmax.f32 %v615_v1, %v619_v10 }
 0x629   :  { %v621_v12 = vrot.slane %v620_v11, 2 }
 0x62b   :  { %v622_v14 = vmax.f32 %v620_v11, %v621_v12 }
 0x62d   :  { %v623_v16 = vrot.slane %v622_v14, 1 }
 0x62f   :  { %v624_v17 = vmax.f32 %v622_v14, %v623_v16 }
 0x631   :  { %v625_v18 = vsub.f32 %v615_v1, %v624_v17  ;;  %v698_v31 = vadd.f32 %v624_v17, %v617_v28 }
 0x633   :  { %v626_v19 = vmul.f32 1.442695, %v625_v18 }
 0x635   :  { %949 = vpow2.f32 %v626_v19 }
 0x63f   :  { %v950_v21 = vpop.eup %949 }
 0x640   :  { %907 = vmatpush3.msra.mxu0 %v950_v21 }
 0x641   :  { %909 = vmatmul.mubr.msk.f32.vlgmr.msra.gmra.mrb[6].mxu0 %vm54_vm2, %v1063_v13 }
 0x714   :  { %v694_v23 = vpop.f32.mrb[6].mxu0 }
 0x715   :  { %v699_v24 = vmax.f32 %v694_v23, 1e-37  ;;  %v910_v25 = vpop.f32.mrb[7].mxu0 }
 0x717   :  { %951 = vlog2.f32 %v699_v24 }
 0x721   :  { %v952_v30 = vpop.eup %951 }
 0x722   :  { %v701_v32 = vmul.f32 0.6931472, %v952_v30 }
 0x724   :  { %v702_v33 = vadd.f32 %v701_v32, %v698_v31 }
 0x726   :  { %v710_v34 = vsel %vm709_vm0, %v702_v33, %v615_v1 }
 0x727   :  { %v714_v35 = vrot.slane %v710_v34, 4 }
 0x729   :  { %v715_v36 = vmax.f32 %v710_v34, %v714_v35 }
 0x72b   :  { %v716_v37 = vrot.slane %v715_v36, 2 }
 0x72d   :  { %v717_v38 = vmax.f32 %v715_v36, %v716_v37 }
 0x72f   :  { %v718_v39 = vrot.slane %v717_v38, 1 }
 0x731   :  { %v719_v40 = vmax.f32 %v717_v38, %v718_v39 }
 0x733   :  { %v720_v41 = vsub.f32 %v710_v34, %v719_v40  ;;  %v793_v52 = vadd.f32 %v719_v40, %v712_v49 }
 0x735   :  { %v721_v42 = vmul.f32 1.442695, %v720_v41 }
 0x737   :  { %953 = vpow2.f32 %v721_v42 }
 0x741   :  { %v954_v43 = vpop.eup %953 }
 0x742   :  { %912 = vmatpush3.msra.mxu1 %v954_v43 }
 0x743   :  { %914 = vmatmul.mubr.msk.f32.vlgmr.msra.gmra.mrb[6].mxu1 %vm54_vm2, %v1063_v13  ;;  %v815_v13 = vpop.permute.xlu0 %814 }
 0x816   :  { %v789_v44 = vpop.f32.mrb[6].mxu1 }
 0x817   :  { %v794_v45 = vmax.f32 %v789_v44, 1e-37  ;;  %v915_v46 = vpop.f32.mrb[7].mxu1 }
 0x819   :  { %955 = vlog2.f32 %v794_v45 }
 0x823   :  { %v956_v51 = vpop.eup %955 }
 0x824   :  { %v796_v53 = vmul.f32 0.6931472, %v956_v51 }
 0x826   :  { %v797_v54 = vadd.f32 %v796_v53, %v793_v52 }
 0x828   :  { %v805_v55 = vsel %vm804_vm3, %v797_v54, %v710_v34 }
 0x829   :  { %v817_v56 = vadd.f32 %v815_v13, %v805_v55 }
 0x82b   :  { %v818_v57 = vrot.slane %v817_v56, 4 }
 0x82d   :  { %v819_v58 = vmax.f32 %v817_v56, %v818_v57 }
 0x82f   :  { %v820_v59 = vrot.slane %v819_v58, 2 }
 0x831   :  { %v821_v60 = vmax.f32 %v819_v58, %v820_v59 }
 0x833   :  { %v822_v61 = vrot.slane %v821_v60, 1 }
 0x835   :  { %v823_v62 = vmax.f32 %v821_v60, %v822_v61 }
 0x837   :  { %v824_v63 = vsub.f32 %v817_v56, %v823_v62 }
 0x839   :  { %v825_v0 = vmul.f32 1.442695, %v824_v63 }
 0x83b   :  { %957 = vpow2.f32 %v825_v0 }
 0x845   :  { %v958_v15 = vpop.eup %957 }
 0x846   :  { %v827_v2 = vrot.slane %v958_v15, 4 }
 0x848   :  { %v828_v20 = vadd.f32 %v958_v15, %v827_v2 }
 0x84a   :  { %v829_v3 = vrot.slane %v828_v20, 2 }
 0x84c   :  { %v830_v4 = vadd.f32 %v829_v3, %v828_v20 }
 0x84e   :  { %v831_v5 = vrot.slane %v830_v4, 1 }
 0x850   :  { %v832_v6 = vadd.f32 %v831_v5, %v830_v4 }
 0x852   :  { %959 = vlog2.f32 %v832_v6 }
 0x85c   :  { %v960_v7 = vpop.eup %959 }
 0x85d   :  { %v834_v8 = vmul.f32 0.6931472, %v960_v7 }
 0x85f   :  { %v835_v9 = vadd.f32 %v834_v8, %v823_v62 }
 0x861   :  { %836 = vst [vmem:[#allocation6] sm:$0x1] %v835_v9 }
 0x862   :  { %994 = shalt.err (!%p991_p12)
}
 0x863   :  { %s995_s25 = scalar_lea.hbm %s1161_s4, 16 }
 0x864   :  { %p996_p13 = scmp.ne.s32.totalorder %s1161_s4, %s995_s25  ;;  %p999_p0 = scmp.lt.u32.totalorder %s995_s25, %s1161_s4 }
 0x866   :  { %p1001_p1 = pnand %p999_p0, %p996_p13 }
 0x868   :  { %1004 = shalt.err (!%p1001_p1)
}
 0x869   :  { %846 = dma.vmem_to_hbm [thread:$0]  %s844_s20, 16, %s1161_s4, [#allocation5]  }
 0x86a   :  { %1007 = dma.done.wait [#allocation5], 16  }
 0x86b   :  { %1008 = vsyncadd [#allocation5], 4294967280 }
 0x86c   :  { %850 = vsyncpa [#allocation4], 1 }
 0x86d   :  { %851 = vsyncpa [#allocation5], 1 }

</bundles_post_ra>
